<compile_context>
chip_gen: v7x
topology: tpu7x:2x2x1
jax: 0.10.0
libtpu: 0.0.40
codegen_flags: <defaults>
</compile_context>

<pallas_src>
import functools

import jax
import jax.numpy as jnp
from jax.experimental import pallas as pl
from jax.experimental.pallas import tpu as pltpu


def _focal_loss_kernel(*refs, gamma, hw, t_hw, s_mul, use_alpha, needs_mask):
    if use_alpha:
        logits_ref, target_ref, alpha_ref, out_ref, acc_ref = refs
    else:
        logits_ref, target_ref, out_ref, acc_ref = refs
        alpha_ref = None

    n_i = pl.program_id(0)
    s_i = pl.program_id(1)

    @pl.when(s_i == 0)
    def _():
        acc_ref[...] = jnp.zeros_like(acc_ref)

    x = logits_ref[...].astype(jnp.float32)            # (C, T) classes x spatial
    t = target_ref[...]                                # (1, T) int32 class ids

    # log-sum-exp over the class (sublane) axis
    xmax = jnp.max(x, axis=0, keepdims=True)                         # (1, T)
    lse = xmax + jnp.log(jnp.sum(jnp.exp(x - xmax), axis=0, keepdims=True))

    # gather true-class logit (and alpha) via one-hot compare on sublanes
    cls = jax.lax.broadcasted_iota(jnp.int32, x.shape, 0)            # (C, T)
    onehot = cls == t
    x_t = jnp.sum(jnp.where(onehot, x, 0.0), axis=0, keepdims=True)  # (1, T)

    log_pt = x_t - lse                                               # (1, T)
    pt = jnp.exp(log_pt)

    if use_alpha:
        a = alpha_ref[...].astype(jnp.float32)                       # (C, 1)
        alpha_t = jnp.sum(jnp.where(onehot, jnp.broadcast_to(a, x.shape), 0.0),
                          axis=0, keepdims=True)
        log_pt = log_pt * alpha_t

    # (1 - pt) ** gamma  (repeated multiplies when gamma is a small integer)
    g = float(gamma)
    if g == int(g) and 0 <= int(g) <= 8:
        w = jnp.ones_like(pt)
        base = 1.0 - pt
        for _ in range(int(g)):
            w = w * base
    else:
        w = (1.0 - pt) ** g

    loss = -w * log_pt                                               # (1, T)

    if needs_mask:
        # mask lanes of the (possibly overhanging) last spatial tile; every op
        # above is strictly per-lane along the spatial axis, so padded-lane
        # garbage never contaminates valid lanes before this point.
        s_blk = n_i * s_mul + s_i
        col = s_blk * t_hw + jax.lax.broadcasted_iota(jnp.int32, loss.shape, 1)
        loss = jnp.where(col < hw, loss, 0.0)

    # elementwise per-lane accumulation (pure VPU adds, hidden under DMA)
    acc_ref[...] += loss

    @pl.when(s_i == pl.num_programs(1) - 1)
    def _():
        # single cross-lane reduce per outer index, not per grid step
        out_ref[...] = jnp.sum(acc_ref[...], keepdims=True)          # (1, 1)


def cross_entropy_focal_loss(logits, target, alpha=None, gamma=0.2,
                             reduction='mean'):
    """Forward of the PyTorch cross_entropy_focal_loss module (mean/sum)."""
    logits = jnp.asarray(logits)
    target = jnp.asarray(target)

    if logits.ndim > 2:
        # Native NCHW path: (N, C, H, W) -> (N, C, H*W); no transpose needed.
        n, c = logits.shape[0], logits.shape[1]
        logits3 = logits.reshape(n, c, -1)
    else:
        # (M, C) path of the reference module: one wrapper transpose (accepted
        # extra HBM pass; this path is rare for this module).
        m0, c = logits.shape
        logits3 = jnp.transpose(logits, (1, 0)).reshape(1, c, m0)
        n = 1
    hw = logits3.shape[2]
    m = n * hw

    target3 = target.reshape(n, 1, hw).astype(jnp.int32)

    use_alpha = alpha is not None
    if use_alpha:
        alpha_arr = jnp.asarray(alpha, jnp.float32).reshape(c, 1)

    # ---- spatial tile size: ~4 MiB of logits per step (~8 MiB on v7x) ------
    itemsize = jnp.dtype(logits3.dtype).itemsize
    try:
        kind = jax.devices()[0].device_kind.lower()
    except Exception:
        kind = ""
    budget_bytes = (8 << 20) if "v7" in kind else (4 << 20)
    # TODO(synk): for extremely large C (> ~8K f32 classes) even a 128-lane
    # tile exceeds the byte budget; class-axis tiling with an online LSE is
    # not implemented.
    budget_t = max(128, (budget_bytes // (c * itemsize)) // 128 * 128)
    if budget_t >= hw:
        t_hw = hw                    # full-dim block is always layout-legal
    else:
        # prefer a multiple of 128 near the budget that divides hw (no mask)
        t_hw = budget_t
        t = budget_t
        lo = max(128, budget_t // 2)
        while t >= lo:
            if hw % t == 0:
                t_hw = t
                break
            t -= 128
    grid_s = pl.cdiv(hw, t_hw)
    needs_mask = (hw % t_hw) != 0

    # ---- outer "parallel" axis (per-partial outputs, v7x dual-TC) ----------
    if n > 1:
        n_par, s_per, s_mul = n, grid_s, 0

        def batch_blk(ni):
            return ni

        def spatial_blk(ni, si):
            return si
    else:
        if grid_s % 2 == 0 and grid_s >= 2:
            n_par, s_per = 2, grid_s // 2
        else:
            n_par, s_per = 1, grid_s
        s_mul = s_per

        def batch_blk(ni):
            return 0

        def spatial_blk(ni, si):
            return ni * s_per + si

    kernel = functools.partial(_focal_loss_kernel, gamma=float(gamma), hw=hw,
                               t_hw=t_hw, s_mul=s_mul, use_alpha=use_alpha,
                               needs_mask=needs_mask)

    in_specs = [
        pl.BlockSpec((None, c, t_hw),
                     lambda ni, si: (batch_blk(ni), 0, spatial_blk(ni, si))),
        pl.BlockSpec((None, 1, t_hw),
                     lambda ni, si: (batch_blk(ni), 0, spatial_blk(ni, si))),
    ]
    args = [logits3, target3]
    if use_alpha:
        in_specs.append(pl.BlockSpec((c, 1), lambda ni, si: (0, 0)))
        args.append(alpha_arr)

    block_bytes = c * t_hw * itemsize
    vmem_limit = int(min(48 << 20,
                         max(16 << 20,
                             2 * block_bytes + 6 * t_hw * 4 + (2 << 20))))

    bytes_accessed = (n * c * hw * itemsize + n * hw * 4
                      + (c * 4 if use_alpha else 0) + n_par * 4)
    cost = pl.CostEstimate(flops=int(12 * n * c * hw + 24 * n * hw),
                           transcendentals=int(n * c * hw + 3 * n * hw),
                           bytes_accessed=int(bytes_accessed))

    out = pl.pallas_call(
        kernel,
        out_shape=jax.ShapeDtypeStruct((n_par, 1, 1), jnp.float32),
        grid_spec=pltpu.PrefetchScalarGridSpec(
            num_scalar_prefetch=0,
            grid=(n_par, s_per),
            in_specs=in_specs,
            out_specs=pl.BlockSpec((None, 1, 1), lambda ni, si: (ni, 0, 0)),
            scratch_shapes=[pltpu.VMEM((1, t_hw), jnp.float32)]),
        compiler_params=pltpu.CompilerParams(
            dimension_semantics=("parallel", "arbitrary"),
            vmem_limit_bytes=vmem_limit),
        cost_estimate=cost,
    )(*args)

    total = jnp.sum(out)
    if reduction == 'mean':
        return total / jnp.float32(m)
    elif reduction == 'sum':
        return total
    # TODO(synk): reduction='none' (per-element loss output) is not implemented
    # in the kernel; only 'mean' and 'sum' scalar reductions are supported.
    raise NotImplementedError("reduction='none' is not supported")


def _reference_loss(logits, target, alpha=None, gamma=0.2, reduction='mean'):
    """Plain-JAX port of the PyTorch forward, for verification."""
    if logits.ndim > 2:
        n, c = logits.shape[0], logits.shape[1]
        logits = logits.reshape(n, c, -1)
        logits = jnp.transpose(logits, (0, 2, 1)).reshape(-1, c)
    target = target.reshape(-1, 1)
    p = jax.nn.softmax(logits.astype(jnp.float32), axis=1)
    pt = jnp.take_along_axis(p, target, axis=1).reshape(-1)
    log_pt = jnp.log(pt)
    if alpha is not None:
        log_pt = log_pt * jnp.asarray(alpha, jnp.float32)[target.reshape(-1)]
    loss = -((1.0 - pt) ** gamma) * log_pt
    return loss.mean() if reduction == 'mean' else loss.sum()


if __name__ == "__main__":
    key = jax.random.PRNGKey(0)
    k1, k2 = jax.random.split(key)

    # Small conv-style shapes: batch=2, channels(classes)=4, spatial=16x16
    logits = jax.random.normal(k1, (2, 4, 16, 16), dtype=jnp.float32)
    target = jax.random.randint(k2, (2, 16, 16), minval=0, maxval=4,
                                dtype=jnp.int32)

    # Path 1: alpha=None, mean reduction, non-integer gamma
    loss = cross_entropy_focal_loss(logits, target, gamma=0.2,
                                    reduction='mean')
    loss = jax.block_until_ready(loss)
    ref = jax.block_until_ready(_reference_loss(logits, target, gamma=0.2,
                                                reduction='mean'))
    if not bool(jnp.allclose(loss, ref, rtol=1e-5, atol=1e-6)):
        raise AssertionError(f"mismatch (mean): pallas={loss} ref={ref}")

    # Path 2: class weights (alpha), sum reduction, integer gamma
    alpha = jnp.array([0.25, 0.5, 0.75, 1.0], jnp.float32)
    loss2 = jax.block_until_ready(
        cross_entropy_focal_loss(logits, target, alpha=alpha, gamma=2.0,
                                 reduction='sum'))
    ref2 = jax.block_until_ready(
        _reference_loss(logits, target, alpha=alpha, gamma=2.0,
                        reduction='sum'))
    if not bool(jnp.allclose(loss2, ref2, rtol=1e-5, atol=1e-5)):
        raise AssertionError(f"mismatch (sum/alpha): pallas={loss2} ref={ref2}")

    print("KERNEL_OK")
</pallas_src>

<mosaic_0001>
module attributes {stable_mosaic.version = 11 : i64} {
  func.func @_focal_loss_kernel(%arg0: i32, %arg1: i32, %arg2: memref<1x4x256xf32, #tpu.memory_space<vmem>>, %arg3: memref<1x1x256xi32, #tpu.memory_space<vmem>>, %arg4: memref<1x1x1xf32, #tpu.memory_space<vmem>>, %arg5: memref<1x256xf32, #tpu.memory_space<vmem>>) attributes {dimension_semantics = [#tpu.dimension_semantics<parallel>, #tpu.dimension_semantics<arbitrary>], iteration_bounds = array<i64: 2, 1>, scalar_prefetch = 0 : i64, scratch_operands = 1 : i64, tpu.core_type = #tpu.core_type<tc>, window_params = [{transform_indices = @transform_0, window_bounds = array<i64: 1, 4, 256>}, {transform_indices = @transform_1, window_bounds = array<i64: 1, 1, 256>}, {transform_indices = @transform_2, window_bounds = array<i64: 1, 1, 1>}]} {
    %c0_i32 = arith.constant 0 : i32
    %0 = arith.cmpi eq, %arg1, %c0_i32 : i32
    %1 = arith.extui %0 : i1 to i32
    %c0_i32_0 = arith.constant 0 : i32
    %2 = arith.cmpi ne, %1, %c0_i32_0 : i32
    scf.if %2 {
      %cst_18 = arith.constant 0.000000e+00 : f32
      %38 = vector.broadcast %cst_18 : f32 to vector<1x256xf32>
      %c0_19 = arith.constant 0 : index
      %c0_20 = arith.constant 0 : index
      %39 = vector.load %arg5[%c0_19, %c0_20] : memref<1x256xf32, #tpu.memory_space<vmem>>, vector<1x256xf32>
      tpu.vector_store %arg5[%c0_19, %c0_20], %38 {strides = array<i32>} : memref<1x256xf32, #tpu.memory_space<vmem>>, vector<1x256xf32>,
    } else {
    }
    %c0 = arith.constant 0 : index
    %c0_1 = arith.constant 0 : index
    %c0_2 = arith.constant 0 : index
    %3 = vector.load %arg2[%c0, %c0_1, %c0_2] : memref<1x4x256xf32, #tpu.memory_space<vmem>>, vector<1x4x256xf32>
    %4 = vector.shape_cast %3 : vector<1x4x256xf32> to vector<4x256xf32>
    %c0_3 = arith.constant 0 : index
    %c0_4 = arith.constant 0 : index
    %c0_5 = arith.constant 0 : index
    %5 = vector.load %arg3[%c0_3, %c0_4, %c0_5] : memref<1x1x256xi32, #tpu.memory_space<vmem>>, vector<1x1x256xi32>
    %6 = vector.shape_cast %5 : vector<1x1x256xi32> to vector<1x256xi32>
    %cst = arith.constant dense<0xFF800000> : vector<256xf32>
    %7 = vector.multi_reduction <maximumf>, %4, %cst [0] : vector<4x256xf32> to vector<256xf32>
    %8 = vector.shape_cast %7 : vector<256xf32> to vector<1x256xf32>
    %9 = vector.broadcast %8 : vector<1x256xf32> to vector<4x256xf32>
    %10 = arith.subf %4, %9 : vector<4x256xf32>
    %11 = math.exp %10 : vector<4x256xf32>
    %cst_6 = arith.constant dense<0.000000e+00> : vector<256xf32>
    %12 = vector.multi_reduction <add>, %11, %cst_6 [0] : vector<4x256xf32> to vector<256xf32>
    %13 = vector.shape_cast %12 : vector<256xf32> to vector<1x256xf32>
    %14 = math.log %13 : vector<1x256xf32>
    %15 = arith.addf %8, %14 : vector<1x256xf32>
    %16 = tpu.iota {dimensions = array<i32: 0>} : vector<4x256xi32>
    %17 = vector.broadcast %6 : vector<1x256xi32> to vector<4x256xi32>
    %18 = arith.cmpi eq, %16, %17 : vector<4x256xi32>
    %cst_7 = arith.constant 0.000000e+00 : f32
    %19 = vector.broadcast %cst_7 : f32 to vector<4x256xf32>
    %20 = arith.select %18, %4, %19 : vector<4x256xi1>, vector<4x256xf32>
    %cst_8 = arith.constant dense<0.000000e+00> : vector<256xf32>
    %21 = vector.multi_reduction <add>, %20, %cst_8 [0] : vector<4x256xf32> to vector<256xf32>
    %22 = vector.shape_cast %21 : vector<256xf32> to vector<1x256xf32>
    %23 = arith.subf %22, %15 : vector<1x256xf32>
    %24 = math.exp %23 : vector<1x256xf32>
    %cst_9 = arith.constant 1.000000e+00 : f32
    %25 = vector.broadcast %cst_9 : f32 to vector<1x256xf32>
    %26 = arith.subf %25, %24 : vector<1x256xf32>
    %cst_10 = arith.constant 2.000000e-01 : f32
    %27 = vector.broadcast %cst_10 : f32 to vector<1x256xf32>
    %28 = math.powf %26, %27 : vector<1x256xf32>
    %cst_11 = arith.constant 0.000000e+00 : f32
    %29 = vector.broadcast %cst_11 : f32 to vector<1x256xf32>
    %30 = arith.subf %29, %28 : vector<1x256xf32>
    %31 = arith.mulf %30, %23 : vector<1x256xf32>
    %c0_12 = arith.constant 0 : index
    %c0_13 = arith.constant 0 : index
    %32 = vector.load %arg5[%c0_12, %c0_13] : memref<1x256xf32, #tpu.memory_space<vmem>>, vector<1x256xf32>
    %33 = arith.addf %32, %31 : vector<1x256xf32>
    %c0_14 = arith.constant 0 : index
    %c0_15 = arith.constant 0 : index
    %34 = vector.load %arg5[%c0_14, %c0_15] : memref<1x256xf32, #tpu.memory_space<vmem>>, vector<1x256xf32>
    tpu.vector_store %arg5[%c0_14, %c0_15], %33 {strides = array<i32>} : memref<1x256xf32, #tpu.memory_space<vmem>>, vector<1x256xf32>,
    %c0_i32_16 = arith.constant 0 : i32
    %35 = arith.cmpi eq, %arg1, %c0_i32_16 : i32
    %36 = arith.extui %35 : i1 to i32
    %c0_i32_17 = arith.constant 0 : i32
    %37 = arith.cmpi ne, %36, %c0_i32_17 : i32
    scf.if %37 {
      %c0_18 = arith.constant 0 : index
      %c0_19 = arith.constant 0 : index
      %38 = vector.load %arg5[%c0_18, %c0_19] : memref<1x256xf32, #tpu.memory_space<vmem>>, vector<1x256xf32>
      %39 = vector.shape_cast %38 : vector<1x256xf32> to vector<1x1x256xf32>
      %cst_20 = arith.constant dense<0.000000e+00> : vector<1xf32>
      %40 = vector.multi_reduction <add>, %39, %cst_20 [1, 2] : vector<1x1x256xf32> to vector<1xf32>
      %41 = vector.shape_cast %40 : vector<1xf32> to vector<1x1x1xf32>
      %42 = vector.extract %41[0, 0, 0] : f32 from vector<1x1x1xf32>
      %43 = vector.broadcast %42 : f32 to vector<1x1xf32>
      %c0_21 = arith.constant 0 : index
      %c0_22 = arith.constant 0 : index
      %c0_23 = arith.constant 0 : index
      %44 = vector.load %arg4[%c0_21, %c0_22, %c0_23] : memref<1x1x1xf32, #tpu.memory_space<vmem>>, vector<1x1x1xf32>
      %45 = vector.shape_cast %44 : vector<1x1x1xf32> to vector<1x1xf32>
      %46 = vector.shape_cast %43 : vector<1x1xf32> to vector<1x1x1xf32>
      tpu.vector_store %arg4[%c0_21, %c0_22, %c0_23], %46 {strides = array<i32>} : memref<1x1x1xf32, #tpu.memory_space<vmem>>, vector<1x1x1xf32>,
    } else {
    }
    return
  }
  func.func @transform_0(%arg0: i32, %arg1: i32) -> (i32, i32, i32) {
    %c0_i32 = arith.constant 0 : i32
    %c0_i32_0 = arith.constant 0 : i32
    return %arg0, %c0_i32, %arg1 : i32, i32, i32
  }
  func.func @transform_1(%arg0: i32, %arg1: i32) -> (i32, i32, i32) {
    %c0_i32 = arith.constant 0 : i32
    %c0_i32_0 = arith.constant 0 : i32
    return %arg0, %c0_i32, %arg1 : i32, i32, i32
  }
  func.func @transform_2(%arg0: i32, %arg1: i32) -> (i32, i32, i32) {
    %c0_i32 = arith.constant 0 : i32
    %c0_i32_0 = arith.constant 0 : i32
    %c0_i32_1 = arith.constant 0 : i32
    return %arg0, %c0_i32, %c0_i32_0 : i32, i32, i32
  }
}

</mosaic_0001>

<bundles_post_ra>
// kernel: tpu_custom_call.1
= control target key start
LH: loop header
LB: loop body
LE: loop exit
PB: predicated region body
PF: predicated region fallthrough
CT: control target
= control target key end

     0   :  { %7 = vsyncpa [#allocation4], 0  ;;  %s953_s0 = inlined_call_operand.hbm [shape: f32[2,4,256], index: 0, kind: input, shape index: {}]   ;;  %s954_s1 = inlined_call_operand.hbm [shape: s32[2,1,256], index: 1, kind: input, shape index: {}]   ;;  %s955_s2 = inlined_call_operand.vmem [shape: f32[2,1,1], index: 2, kind: output, shape index: {}]  }
   0x1   :  { %9 = vsyncpa [#allocation4 + $0x1], 0 }
   0x2   :  { %10 = vsyncpa [#allocation6], 0 }
   0x3   :  { %12 = vsyncpa [#allocation6 + $0x1], 0  ;;  %s758_s9 = smov 0   ;;  %s760_s10 = smov 0  }
   0x4   :  { %s762_s11 = smov 0   ;;  %s764_s12 = smov 0  }
   0x5   :  { %s766_s13 = smov 0   ;;  %s768_s14 = smov 0  }
   0x6 LB: > { %s471_s15 = sadd.s32 4294967295, %s737_s14   ;;  %s30_s16 = sadd.s32 1, %s733_s13  ;;  %s737_s14 = sphi %s768_s14, %s18_s14   ;;  %s733_s13 = sphi %s766_s13, %s971_s13   ;;  %s729_s12 = sphi %s764_s12, %s970_s12   ;;  %s725_s11 = sphi %s762_s11, %s969_s11   ;;  %s721_s10 = sphi %s760_s10, %s968_s10   ;;  %s717_s9 = sphi %s758_s9, %s967_s9  }
   0x7   : > { %p32_p0 = scmp.ge.s32.totalorder %s30_s16, 2  ;;  %s39_s17 = sadd.s32 1, %s725_s11 }
   0x8   : > { %p46_p1 = scmp.ne.s32.totalorder %s725_s11, %s721_s10  ;;  %p47_p2 = scmp.eq.s32.totalorder %s737_s14, 0 }
   0x9   : > { %s973_s16 = smov (%p32_p0, %s30_s16), 0  ;;  %p52_p4 = scmp.ne.s32.totalorder %s721_s10, %s717_s9 }
   0xa   : > { %p794_p3 = por %p47_p2, %p46_p1  ;;  %s34_s19 = ssub.s32 %s733_s13, %s973_s16 }
   0xb   : > { %p53_p5 = scmp.eq.s32.totalorder %s471_s15, 0  ;;  %p37_p6 = scmp.eq.s32.totalorder %s34_s19, 0 }
   0xc   : > { %p553_p8 = scmp.lt.s32.totalorder %s737_s14, 2  ;;  %s810_s22 = sand.u32 1, %s725_s11  }
   0xd   : > { %p801_p7 = por %p53_p5, %p52_p4  ;;  %s486_s23 = sshll.u32 %s733_s13, 7 }
   0xe   : > { %s807_s21 = scalar_select %p37_p6, %s725_s11, %s39_s17  }
   0xf   : > { %s958_s20 = scalar_select %p801_p7, 1, 0 }
  0x10   : > { %s475_s24 = sshll.u32 %s810_s22, 3  ;;  %s817_s27 = scalar_lea.hbm %s953_s0, %s486_s23 }
  0x11   : > { %s134_s28 = scalar_lea.vmem [#allocation3], %s475_s24  ;;  %p821_p9 = pnand %p553_p8, %p794_p3 }
  0x12   : > { %s144_s29 = sshll.u32 %s134_s28, 4  ;;  %s131_s3 = scalar_lea.sflag [#allocation4], %s810_s22  ;;  %s825_s29 = int_to_ptr.vmem [resolvable:$true] %s144_s29 }
  0x13   : > { %s623_s4 = scalar_lea.hbm %s817_s27, 128  ;;  %p625_p13 = pneg %p821_p9 }
  0x14   : > { %p624_p12 = scmp.ne.s32.totalorder %s817_s27, %s623_s4  ;;  %s628_s7 = scalar_lea.hbm %s953_s0, 256 }
  0x15   : > { %p629_p2 = scmp.lt.u32.totalorder %s817_s27, %s953_s0  ;;  %p630_p3 = scmp.lt.u32.totalorder %s628_s7, %s623_s4 }
  0x16   : > { %p626_p0 = pnand %p625_p13, %p624_p12  ;;  %p632_p5 = scmp.lt.u32.totalorder %s623_s4, %s817_s27 }
  0x17   : > { %p631_p4 = por %p630_p3, %p629_p2 }
  0x18   : > { %p627_p1 = pneg %p626_p0 }
  0x19   : > { %p633_p6 = por %p632_p5, %p631_p4 }
  0x1b   : > { %p634_p8 = pnand %p633_p6, %p627_p1 }
  0x1d   : > { %637 = shalt.err (!%p634_p8)
}
  0x1e   : > { %s638_s15 = scalar_lea.vmem %s825_s29, 128  ;;  %s739_s17 = smov [#allocation3]  }
  0x1f   : > { %p639_p12 = scmp.ne.s32.totalorder %s825_s29, %s638_s15  ;;  %s643_s18 = sshll.u32 %s739_s17, 4  ;;  %s644_s18 = int_to_ptr.vmem [resolvable:$false] %s643_s18 }
  0x20   : > { %s645_s19 = scalar_lea.vmem %s644_s18, 256  ;;  %p646_p11 = scmp.lt.s32.totalorder %s825_s29, %s644_s18 }
  0x21   : > { %p641_p0 = pnand %p639_p12, %p625_p13  ;;  %p647_p2 = scmp.lt.s32.totalorder %s645_s19, %s638_s15 }
  0x23   : > { %p642_p10 = pneg %p641_p0  ;;  %p648_p3 = por %p647_p2, %p646_p11 }
  0x25   : > { %p649_p4 = pnand %p648_p3, %p642_p10 }
  0x27   : > { %652 = shalt.err (!%p649_p4)
}
  0x28   : > { %549 = dma.hbm_to_vmem [thread:$0]  (!%p821_p9), %s817_s27, 128, %s825_s29, %s131_s3  }
  0x29   : > { %p960_p1 = scmp.lt.s32.totalorder %s737_s14, 3  ;;  %p961_p5 = scmp.ge.s32.totalorder %s737_s14, 1 }
  0x2a   : > { %s478_s24 = sshll.u32 %s810_s22, 1  ;;  %s487_s25 = sshll.u32 %s733_s13, 5 }
  0x2b   : > { %p859_p6 = pnand %p961_p5, %p960_p1  ;;  %s868_s4 = scalar_lea.hbm %s954_s1, %s487_s25 }
  0x2c   : > { %s155_s5 = scalar_lea.vmem [#allocation5], %s478_s24  ;;  %s152_s27 = scalar_lea.sflag [#allocation6], %s810_s22 }
  0x2d   : > { %s962_s23 = scalar_select %p859_p6, 1, 0 }
  0x2e   : > { %s165_s6 = sshll.u32 %s155_s5, 4  ;;  %s653_s29 = scalar_lea.hbm %s868_s4, 32  ;;  %s166_s6 = int_to_ptr.vmem [resolvable:$true] %s165_s6 }
  0x2f   : > { %p654_p10 = scmp.ne.s32.totalorder %s868_s4, %s653_s29  ;;  %s658_s8 = scalar_lea.hbm %s954_s1, 64 }
  0x30   : > { %p659_p12 = scmp.lt.u32.totalorder %s868_s4, %s954_s1  ;;  %p660_p0 = scmp.lt.u32.totalorder %s658_s8, %s653_s29 }
  0x31   : > { %p656_p11 = pnand %p654_p10, %p625_p13  ;;  %p662_p3 = scmp.lt.u32.totalorder %s653_s29, %s868_s4 }
  0x32   : > { %p661_p2 = por %p660_p0, %p659_p12 }
  0x33   : > { %p657_p8 = pneg %p656_p11 }
  0x34   : > { %p663_p4 = por %p662_p3, %p661_p2 }
  0x36   : > { %p664_p1 = pnand %p663_p4, %p657_p8 }
  0x38   : > { %667 = shalt.err (!%p664_p1)
}
  0x39   : > { %s668_s22 = scalar_lea.vmem %s166_s6, 32  ;;  %s740_s17 = smov [#allocation5]  }
  0x3a   : > { %p669_p5 = scmp.ne.s32.totalorder %s166_s6, %s668_s22  ;;  %s673_s18 = sshll.u32 %s740_s17, 4  ;;  %s674_s18 = int_to_ptr.vmem [resolvable:$false] %s673_s18 }
  0x3b   : > { %s675_s19 = scalar_lea.vmem %s674_s18, 64  ;;  %p676_p7 = scmp.lt.s32.totalorder %s166_s6, %s674_s18 }
  0x3c   : > { %p671_p10 = pnand %p669_p5, %p625_p13  ;;  %p677_p6 = scmp.lt.s32.totalorder %s675_s19, %s668_s22 }
  0x3e   : > { %p672_p11 = pneg %p671_p10  ;;  %p678_p0 = por %p677_p6, %p676_p7 }
  0x40   : > { %p679_p12 = pnand %p678_p0, %p672_p11 }
  0x42   : > { %682 = shalt.err (!%p679_p12)
}
  0x43   : > { %552 = dma.hbm_to_vmem [thread:$0]  (!%p821_p9), %s868_s4, 32, %s166_s6, %s152_s27  }
  0x44   : > { %p963_p8 = scmp.ne.s32.totalorder %s962_s23, 0 }
  0x45   : > { %s176_s24 = sand.u32 (!%p963_p8), 1, %s721_s10   ;;  %p964_p13 = scmp.ne.s32.totalorder (!%p963_p8), %s958_s20, 0 }
  0x46   : > { %174 = sbr.rel (%p963_p8) target bundleno = 423 (0x1a7), region = 28  ;;  %s482_s25 = sshll.u32 (!%p963_p8), %s176_s24, 3 }
  0x47   : > { %s177_s26 = scalar_lea.sflag (!%p963_p8), [#allocation4], %s176_s24  ;;  %s180_s28 = scalar_lea.vmem (!%p963_p8), [#allocation3], %s482_s25 }
  0x4d   : > { %708 = dma.done.wait (%p964_p13), %s177_s26, 128  }
  0x4e   : > { %710 = vsyncadd (%p964_p13), %s177_s26, 4294967168  ;;  %s483_s5 = sshll.u32 %s176_s24, 1  ;;  %s186_s29 = scalar_lea.sflag [#allocation6], %s176_s24 }
  0x4f   : > { %s189_s30 = scalar_lea.vmem [#allocation5], %s483_s5 }
  0x50   : > { %712 = dma.done.wait (%p964_p13), %s186_s29, 32  }
  0x51   : > { %714 = vsyncadd (%p964_p13), %s186_s29, 4294967264  ;;  %v222_v0 = vlaneseq  ;;  %v741_v2 = vmov 0.0   ;;  %vm232_vm1 = vcmask 1043456   ;;  %v227_v3 = vld [vmem:[%s180_s28] sm:$0xff]  ;;  %v228_v24 = vld [vmem:[%s189_s30] sm:$0x3] }
  0x52   : > { %v230_v4 = vcombine.high %v227_v3, %v227_v3  ;;  %v233_v5 = vsel %vm232_vm1, %v227_v3, -inf  ;;  %vm359_vm14 = vcmask 1040384   ;;  %p215_p7 = scmp.lt.s32.totalorder %s729_s12, 1  ;;  %vm373_vm15 = vcmask 0  }
  0x53   : > { %vm901_vm0 = vcmp.lt.s32.totalorder %v222_v0, 256  ;;  %v234_v6 = vrot.slane %v233_v5, 4  ;;  %v909_v20 = vshrl.u32 %v222_v0, 7 }
  0x54   : > { %226 = vst.msk [vmem:[#allocation2] sm:$0x3] %vm901_vm0, %v741_v2  ;;  %v240_v7 = vsel %vm232_vm1, %v230_v4, -inf  ;;  %s975_s12 = smov (!%p215_p7, %s729_s12), 1 }
  0x55   : > { %v235_v8 = vmax.f32 %v233_v5, %v234_v6  ;;  %v241_v9 = vrot.slane %v240_v7, 4  ;;  %v281_v23 = vsub.s32 0, %v909_v20  ;;  %v285_v25 = vsub.s32 1, %v909_v20  ;;  %s217_s4 = scalar_lea.vmem %s955_s2, %s975_s12 }
  0x57   : > { %v236_v10 = vrot.slane %v235_v8, 2  ;;  %v242_v11 = vmax.f32 %v240_v7, %v241_v9  ;;  %v282_v26 = vrot.slane %v228_v24, %v281_v23  ;;  %v286_v27 = vrot.slane %v228_v24, %v285_v25 }
  0x59   : > { %v237_v12 = vmax.f32 %v235_v8, %v236_v10  ;;  %v243_v13 = vrot.slane %v242_v11, 2  ;;  %vm287_vm2 = vcmp.eq.s32.totalorder %v909_v20, %v282_v26  ;;  %vm288_vm3 = vcmp.eq.s32.totalorder %v909_v20, %v286_v27 }
  0x5a   : > { %v289_v28 = vsel %vm287_vm2, %v227_v3, 0.0  ;;  %v290_v32 = vsel %vm288_vm3, %v230_v4, 0.0 }
  0x5b   : > { %v238_v14 = vrot.slane %v237_v12, 1  ;;  %v244_v15 = vmax.f32 %v242_v11, %v243_v13  ;;  %v291_v34 = vsel %vm232_vm1, %v289_v28, 0.0  ;;  %v298_v38 = vsel %vm232_vm1, %v290_v32, 0.0 }
  0x5c   : > { %v292_v39 = vrot.slane %v291_v34, 4  ;;  %v299_v42 = vrot.slane %v298_v38, 4 }
  0x5d   : > { %v239_v16 = vmax.f32 %v237_v12, %v238_v14  ;;  %v245_v17 = vrot.slane %v244_v15, 1 }
  0x5e   : > { %v293_v45 = vadd.f32 %v292_v39, %v291_v34  ;;  %v300_v48 = vadd.f32 %v299_v42, %v298_v38  ;;  %v319_v42 = vld [vmem:[#allocation2] sm:$0x3] }
  0x5f   : > { %v246_v18 = vmax.f32 %v244_v15, %v245_v17 }
  0x60   : > { %v294_v51 = vrot.slane %v293_v45, 2  ;;  %v301_v53 = vrot.slane %v300_v48, 2 }
  0x61   : > { %v249_v19 = vcombine.low %v239_v16, %v246_v18 }
  0x62   : > { %v295_v54 = vadd.f32 %v294_v51, %v293_v45  ;;  %v302_v55 = vadd.f32 %v301_v53, %v300_v48 }
  0x63   : > { %v251_v21 = vsub.f32 %v227_v3, %v249_v19 }
  0x64   : > { %v296_v56 = vrot.slane %v295_v54, 1  ;;  %v303_v57 = vrot.slane %v302_v55, 1 }
  0x65   : > { %v252_v22 = vmul.f32 1.442695, %v251_v21 }
  0x66   : > { %v297_v60 = vadd.f32 %v296_v56, %v295_v54  ;;  %v304_v0 = vadd.f32 %v303_v57, %v302_v55 }
  0x67   : > { %605 = vpow2.f32 %v252_v22  ;;  %v742_v22 = vmov 1966171168  }
  0x68   : > { %v324_v24 = vunpack.c.l.s4 %v742_v22 }
  0x6a   : > { %v325_v34 = vunpack.c.0.s8 %v324_v24 }
  0x6c   : > { %v328_v39 = vsub.s32 %v325_v34, %v909_v20 }
  0x71   : > { %v606_v29 = vpop.eup %605 }
  0x72   : > { %v255_v30 = vcombine.high %v606_v29, %v606_v29  ;;  %v257_v31 = vsel %vm232_vm1, %v606_v29, 0.0 }
  0x73   : > { %v258_v33 = vrot.slane %v257_v31, 4 }
  0x74   : > { %v264_v35 = vsel %vm232_vm1, %v255_v30, 0.0 }
  0x75   : > { %v259_v36 = vadd.f32 %v258_v33, %v257_v31  ;;  %v265_v37 = vrot.slane %v264_v35, 4 }
  0x77   : > { %v260_v40 = vrot.slane %v259_v36, 2  ;;  %v266_v41 = vadd.f32 %v265_v37, %v264_v35 }
  0x79   : > { %v261_v43 = vadd.f32 %v260_v40, %v259_v36  ;;  %v267_v44 = vrot.slane %v266_v41, 2 }
  0x7b   : > { %v262_v46 = vrot.slane %v261_v43, 1  ;;  %v268_v47 = vadd.f32 %v267_v44, %v266_v41 }
  0x7d   : > { %v263_v49 = vadd.f32 %v262_v46, %v261_v43  ;;  %v269_v50 = vrot.slane %v268_v47, 1 }
  0x7f   : > { %v270_v52 = vadd.f32 %v269_v50, %v268_v47  ;;  %607 = vlog2.f32 %v263_v49 }
  0x81   : > { %609 = vlog2.f32 %v270_v52 }
  0x89   : > { %v608_v58 = vpop.eup %607 }
  0x8a   : > { %v272_v59 = vmul.f32 0.6931472, %v608_v58 }
  0x8b   : > { %v610_v61 = vpop.eup %609 }
  0x8c   : > { %v274_v62 = vmul.f32 0.6931472, %v610_v61  ;;  %v275_v63 = vadd.f32 %v272_v59, %v239_v16 }
  0x8e   : > { %v276_v2 = vadd.f32 %v274_v62, %v246_v18  ;;  %v305_v3 = vsub.f32 %v297_v60, %v275_v63 }
  0x90   : > { %v306_v4 = vsub.f32 %v304_v0, %v276_v2  ;;  %v307_v5 = vmul.f32 1.442695, %v305_v3 }
  0x92   : > { %611 = vpow2.f32 %v307_v5  ;;  %v309_v6 = vmul.f32 1.442695, %v306_v4 }
  0x94   : > { %613 = vpow2.f32 %v309_v6 }
  0x9c   : > { %v612_v7 = vpop.eup %611 }
  0x9d   : > { %v311_v8 = vsub.f32 1.0, %v612_v7 }
  0x9e   : > { %v614_v9 = vpop.eup %613 }
  0x9f   : > { %v312_v10 = vsub.f32 1.0, %v614_v9  ;;  %v492_v11 = vand.u32 2147483647, %v311_v8  ;;  %vm496_vm4 = vcmp.lt.f32.partialorder %v311_v8, 0  ;;  %vm497_vm5 = vcmp.eq.f32.partialorder %v311_v8, 0 }
  0xa0   : > { %vm509_vm8 = vcmp.ne.f32.partialorder %v311_v8, %v311_v8  ;;  %vm498_vm10 = vcmp.eq.f32.partialorder %v311_v8, 1065353216 }
  0xa1   : > { %615 = vlog2.f32 %v492_v11  ;;  %v518_v12 = vand.u32 2147483647, %v312_v10  ;;  %vm501_vm6 = vcmp.eq.f32.partialorder %v492_v11, 2139095040  ;;  %vm522_vm7 = vcmp.lt.f32.partialorder %v312_v10, 0 }
  0xa2   : > { %vm523_vm9 = vcmp.eq.f32.partialorder %v312_v10, 0  ;;  %vm535_vm12 = vcmp.ne.f32.partialorder %v312_v10, %v312_v10  ;;  %vm524_vm13 = vcmp.eq.f32.partialorder %v312_v10, 1065353216 }
  0xa3   : > { %617 = vlog2.f32 %v518_v12  ;;  %vm527_vm11 = vcmp.eq.f32.partialorder %v518_v12, 2139095040 }
  0xab   : > { %v616_v13 = vpop.eup %615 }
  0xac   : > { %v494_v14 = vmul.f32 0.2, %v616_v13 }
  0xad   : > { %v618_v15 = vpop.eup %617 }
  0xae   : > { %619 = vpow2.f32 %v494_v14  ;;  %v520_v16 = vmul.f32 0.2, %v618_v15 }
  0xb0   : > { %621 = vpow2.f32 %v520_v16 }
  0xb8   : > { %v620_v17 = vpop.eup %619 }
  0xb9   : > { %v502_v18 = vsel %vm496_vm4, 2143289344, %v620_v17 }
  0xba   : > { %v622_v19 = vpop.eup %621  ;;  %v503_v21 = vsel %vm497_vm5, 0, %v502_v18 }
  0xbb   : > { %v508_v26 = vsel %vm501_vm6, 2139095040, %v503_v21  ;;  %v528_v27 = vsel %vm522_vm7, 2143289344, %v622_v19 }
  0xbc   : > { %v512_v28 = vsel %vm509_vm8, 2143289344, %v508_v26  ;;  %v529_v29 = vsel %vm523_vm9, 0, %v528_v27 }
  0xbd   : > { %v513_v30 = vsel %vm498_vm10, 1065353216, %v512_v28  ;;  %v534_v31 = vsel %vm527_vm11, 2139095040, %v529_v29 }
  0xbe   : > { %v538_v32 = vsel %vm535_vm12, 2143289344, %v534_v31  ;;  %v315_v33 = vsub.f32 0.0, %v513_v30 }
  0xbf   : > { %v539_v35 = vsel %vm524_vm13, 1065353216, %v538_v32 }
  0xc0   : > { %v316_v36 = vsub.f32 0.0, %v539_v35  ;;  %v317_v37 = vmul.f32 %v315_v33, %v305_v3 }
  0xc2   : > { %v318_v38 = vmul.f32 %v316_v36, %v306_v4 }
  0xc4   : > { %v322_v40 = vcombine.low %v317_v37, %v318_v38 }
  0xc6   : > { %v329_v41 = vrot.slane %v322_v40, %v328_v39 }
  0xc8   : > { %v336_v43 = vrot.slane %v329_v41, %v328_v39 }
  0xca   : > { %v338_v44 = vadd.f32 %v336_v43, %v319_v42 }
  0xcc   : > { %343 = vst.msk [vmem:[#allocation2] sm:$0x3] %vm901_vm0, %v338_v44 }
  0xd3   : > { %v347_v45 = vld [vmem:[#allocation2] sm:$0x3] }
  0xd4   : > { %v352_v46 = vrot.slane %v347_v45, %v281_v23  ;;  %v356_v47 = vrot.slane %v347_v45, %v285_v25 }
  0xd6   : > { %v360_v48 = vsel %vm359_vm14, %v352_v46, 0.0  ;;  %v361_v49 = vsel %vm359_vm14, %v356_v47, 0.0 }
  0xd7   : > { %v362_v50 = vadd.f32 %v361_v49, %v360_v48 }
  0xd9   : > { %363 = vadd.xlane.f32.xlu0 %v362_v50 }
 0x166   : > { %v364_v51 = vpop.xlane.xlu0 %363 }
 0x167   : > { %v365_v52 = vrot.slane %v364_v51, 4 }
 0x169   : > { %v366_v53 = vadd.f32 %v365_v52, %v364_v51 }
 0x16b   : > { %v367_v54 = vrot.slane %v366_v53, 2 }
 0x16d   : > { %v368_v1 = vadd.f32 %v367_v54, %v366_v53 }
 0x16f   : > { %v369_v55 = vrot.slane %v368_v1, 1 }
 0x171   : > { %v370_v56 = vadd.f32 %v369_v55, %v368_v1 }
 0x173   : > { %540 = vpush %v370_v56 }
 0x1a4   : > { %s541_s6 = spop %540 }
 0x1a5   : > { %v372_v20 = vstv %s541_s6 }
 0x1a6   : > { %374 = vst.msk [vmem:[%s217_s4] sm:$0x1] %vm373_vm15, %v372_v20 }
 0x1a7 PF: > { %s18_s14 = sadd.s32 1, %s737_s14   ;;  %s967_s9 = smov %s721_s10 }
 0x1a8   : > { %p15_p9 = scmp.ge.s32.totalorder %s18_s14, 4   ;;  %s968_s10 = smov %s725_s11 }
 0x1a9   : > { %s969_s11 = smov %s807_s21  ;;  %s970_s12 = smov %s733_s13 }
 0x1aa   : > { %s971_s13 = smov %s973_s16  ;;  %17 = sbr.rel (!%p15_p9) target bundleno = 6 (0x6), region = 89 }
 0x1b1   :  { %392 = vsyncpa [#allocation4], 1 }
 0x1b2   :  { %394 = vsyncpa [#allocation4 + $0x1], 1 }
 0x1b3   :  { %395 = vsyncpa [#allocation6], 1 }
 0x1b4   :  { %397 = vsyncpa [#allocation6 + $0x1], 1 }

</bundles_post_ra>
